<compile_context>
chip_gen: v6e
topology: v6e:2x2x1
jax: 0.10.0
libtpu: 0.0.40
codegen_flags: <defaults>
</compile_context>

<pallas_src>
import functools

import jax
import jax.numpy as jnp
from jax.experimental import pallas as pl
from jax.experimental.pallas import tpu as pltpu


# Multiple of 128 (legal lane block dim).  In the batch-on-lanes layout one
# 8192-wide tile is ~(8 + 32 + 8) sublanes x 8192 lanes x 4 B < 2 MiB even
# double-buffered, far under every generation's scoped-VMEM default.
_TILE_B_MAX = 8192

# Below this many rows, a fused XLA graph beats the pallas_call overhead.
_XLA_FALLBACK_B = 1024


def _discriminator_kernel(xa_ref, w1_ref, b1_ref, w2_ref, b2_ref, out_ref):
    """Batch-on-lanes fused MLP tile.

    xa_ref : [S+A, tile_b]  compute dtype  -- activations, batch on lane axis
    w1_ref : [H, S+A]       compute dtype  -- fc1 weight (resident in VMEM)
    b1_ref : [H, 1]         f32            -- fc1 bias column (resident)
    w2_ref : [H, 1]         f32            -- fc2 weight column (resident)
    b2_ref : (1,)           f32 in SMEM    -- fc2 bias scalar
    out_ref: [1, tile_b]    f32            -- lane-dense probabilities
    """
    # fc1: single MXU matmul (concat already fused upstream), f32 accumulation.
    h = jnp.dot(w1_ref[...], xa_ref[...],
                preferred_element_type=jnp.float32)          # [H, tile_b]
    h = jnp.maximum(h + b1_ref[...], 0.0)                    # bias + ReLU (VPU)

    # fc2 (output width 1): per-lane multiply + sublane reduction over H.
    # Result is already the lane-dense [1, tile_b] output row -> no relayout.
    logit = jnp.sum(h * w2_ref[...], axis=0, keepdims=True) + b2_ref[0]
    out_ref[...] = jax.nn.sigmoid(logit).astype(out_ref.dtype)


def discriminator_forward(x, a, params, *, force_pallas=False):
    """x: [B, state_dim], a: [B, action_dim] -> [B, 1] float32 probabilities."""
    w1t, b1, w2, b2 = params["w1t"], params["b1"], params["w2"], params["b2"]
    B = x.shape[0]
    H, K = w1t.shape                     # K = state_dim + action_dim
    compute_dtype = w1t.dtype

    if B < _XLA_FALLBACK_B and not force_pallas:
        # Tiny rollout batches: plain fused XLA path (same math, same dtypes).
        xa = jnp.concatenate([x, a], axis=1).astype(compute_dtype)
        h = jnp.maximum(
            jnp.dot(xa, w1t.T, preferred_element_type=jnp.float32)
            + b1.reshape(1, H), 0.0)
        return jax.nn.sigmoid(h @ w2 + b2.reshape(1, 1))

    # One producer op builds the [S+A, B] batch-on-lanes slab in the compute
    # dtype (concat + transpose + cast fuse into a single XLA pass).
    xa_t = jnp.concatenate([x.T, a.T], axis=0).astype(compute_dtype)

    # tile_b: full batch when it fits (block == full array dims is always
    # legal), else 8192 (multiple of 128; Pallas pads reads and masks the
    # partial last tile's lane store).
    tile_b = B if B <= _TILE_B_MAX else _TILE_B_MAX
    grid = (pl.cdiv(B, tile_b),)

    out = pl.pallas_call(
        _discriminator_kernel,
        out_shape=jax.ShapeDtypeStruct((1, B), jnp.float32),
        grid=grid,
        in_specs=[
            pl.BlockSpec((K, tile_b), lambda i: (0, i)),        # xaT batch tile
            pl.BlockSpec((H, K), lambda i: (0, 0)),             # W1   (resident)
            pl.BlockSpec((H, 1), lambda i: (0, 0)),             # b1   (resident)
            pl.BlockSpec((H, 1), lambda i: (0, 0)),             # w2   (resident)
            pl.BlockSpec(memory_space=pltpu.MemorySpace.SMEM),  # b2 scalar
        ],
        out_specs=pl.BlockSpec((1, tile_b), lambda i: (0, i)),  # lane-dense out
        compiler_params=pltpu.CompilerParams(
            dimension_semantics=("parallel",),  # v7x: both TCs split the batch
        ),
    )(xa_t, w1t, b1, w2, b2)
    return out.reshape(B, 1)


def init_params(key, state_dim, hidden_dim, action_dim, dtype=jnp.float32):
    """nn.Linear-style init, stored once in the kernel's final layout/dtype.

    w1t is kept in PyTorch's [out, in] = [H, S+A] layout (exactly what the
    transposed kernel wants: hT = W1 @ xaT).  b1 / w2 are stored as f32 [H, 1]
    columns (they broadcast over lanes / drive the sublane fc2 reduction) and
    b2 is a (1,) f32 scalar destined for SMEM.  Pass dtype=jnp.bfloat16 on
    v6e/v7x to halve fc1 HBM traffic; f32 accumulation and the f32 epilogue
    are preserved inside the kernel.
    """
    k1, k2, k3, k4 = jax.random.split(key, 4)
    in1 = state_dim + action_dim
    bound1 = 1.0 / (in1 ** 0.5)
    bound2 = 1.0 / (hidden_dim ** 0.5)
    w1 = jax.random.uniform(k1, (hidden_dim, in1), jnp.float32, -bound1, bound1)
    b1 = jax.random.uniform(k2, (hidden_dim,), jnp.float32, -bound1, bound1)
    w2 = jax.random.uniform(k3, (1, hidden_dim), jnp.float32, -bound2, bound2)
    b2 = jax.random.uniform(k4, (1,), jnp.float32, -bound2, bound2)
    return {
        "w1t": w1.astype(dtype),                 # [H, S+A] (PyTorch [out, in])
        "b1": b1.reshape(hidden_dim, 1),         # [H, 1] f32 column
        "w2": w2.reshape(hidden_dim, 1),         # [H, 1] f32 column
        "b2": b2,                                # (1,)  f32 scalar (SMEM)
    }


def _reference_forward(x, a, params):
    """Pure-JAX reference with the original module's semantics."""
    w1 = params["w1t"].astype(jnp.float32)       # [H, S+A]
    b1 = params["b1"].reshape(1, -1)             # [1, H]
    w2 = params["w2"].reshape(-1, 1)             # [H, 1]
    b2 = params["b2"].reshape(1, 1)
    xa = jnp.concatenate([x.astype(jnp.float32), a.astype(jnp.float32)], axis=1)
    h = jnp.maximum(xa @ w1.T + b1, 0.0)
    return jax.nn.sigmoid(h @ w2 + b2)


if __name__ == "__main__":
    # Small shapes implied by the module: batch=2, state_dim=4, action_dim=2,
    # hidden=32.
    B, STATE_DIM, ACTION_DIM, HIDDEN_DIM = 2, 4, 2, 32

    key = jax.random.PRNGKey(0)
    kx, ka, kp, kx2, ka2 = jax.random.split(key, 5)
    params = init_params(kp, STATE_DIM, HIDDEN_DIM, ACTION_DIM)

    # 1) Small-shape check: force the Pallas path (below the XLA-fallback
    #    threshold) so the kernel itself is exercised and verified.
    x = jax.random.normal(kx, (B, STATE_DIM), jnp.float32)
    a = jax.random.normal(ka, (B, ACTION_DIM), jnp.float32)
    fwd_pallas = jax.jit(functools.partial(discriminator_forward, force_pallas=True))
    out = jax.block_until_ready(fwd_pallas(x, a, params))
    ref = _reference_forward(x, a, params)
    assert out.shape == (B, 1), out.shape
    assert jnp.allclose(out, ref, atol=3e-5, rtol=3e-5), (out, ref)

    # 2) Multi-tile check: exercises the tiled grid, the partial last tile,
    #    and the masked lane-dense store path (auto-dispatches to Pallas).
    B2 = _TILE_B_MAX + 320
    x2 = jax.random.normal(kx2, (B2, STATE_DIM), jnp.float32)
    a2 = jax.random.normal(ka2, (B2, ACTION_DIM), jnp.float32)
    fwd = jax.jit(discriminator_forward)
    out2 = jax.block_until_ready(fwd(x2, a2, params))
    ref2 = _reference_forward(x2, a2, params)
    assert out2.shape == (B2, 1), out2.shape
    assert jnp.allclose(out2, ref2, atol=3e-5, rtol=3e-5)

    print("KERNEL_OK")
</pallas_src>

<mosaic_0001>
module attributes {stable_mosaic.version = 11 : i64} {
  func.func @_discriminator_kernel(%arg0: i32, %arg1: memref<6x2xf32, #tpu.memory_space<vmem>>, %arg2: memref<32x6xf32, #tpu.memory_space<vmem>>, %arg3: memref<32x1xf32, #tpu.memory_space<vmem>>, %arg4: memref<32x1xf32, #tpu.memory_space<vmem>>, %arg5: memref<1xf32, #tpu.memory_space<smem>>, %arg6: memref<1x2xf32, #tpu.memory_space<vmem>>) attributes {dimension_semantics = [#tpu.dimension_semantics<parallel>], iteration_bounds = array<i64: 1>, scalar_prefetch = 0 : i64, scratch_operands = 0 : i64, tpu.core_type = #tpu.core_type<tc>, window_params = [{transform_indices = @transform_0, window_bounds = array<i64: 6, 2>}, {pipeline_mode = #tpu.pipeline_mode<synchronous>, transform_indices = @transform_1, window_bounds = array<i64: 32, 6>}, {pipeline_mode = #tpu.pipeline_mode<synchronous>, transform_indices = @transform_2, window_bounds = array<i64: 32, 1>}, {pipeline_mode = #tpu.pipeline_mode<synchronous>, transform_indices = @transform_3, window_bounds = array<i64: 32, 1>}, {transform_indices = @transform_4, window_bounds = array<i64: 1>}, {transform_indices = @transform_5, window_bounds = array<i64: 1, 2>}]} {
    %c0 = arith.constant 0 : index
    %c0_0 = arith.constant 0 : index
    %0 = vector.load %arg2[%c0, %c0_0] : memref<32x6xf32, #tpu.memory_space<vmem>>, vector<32x6xf32>
    %c0_1 = arith.constant 0 : index
    %c0_2 = arith.constant 0 : index
    %1 = vector.load %arg1[%c0_1, %c0_2] : memref<6x2xf32, #tpu.memory_space<vmem>>, vector<6x2xf32>
    %cst = arith.constant dense<0.000000e+00> : vector<32x2xf32>
    %2 = tpu.matmul %0, %1, %cst {dimension_numbers = #tpu.dot_dimension_numbers<[1], [0], [0], [1], [0, 0, 1, 1], [], []>} : vector<32x6xf32>, vector<6x2xf32>, vector<32x2xf32> -> vector<32x2xf32>
    %c0_3 = arith.constant 0 : index
    %c0_4 = arith.constant 0 : index
    %3 = vector.load %arg3[%c0_3, %c0_4] : memref<32x1xf32, #tpu.memory_space<vmem>>, vector<32x1xf32>
    %4 = vector.broadcast %3 : vector<32x1xf32> to vector<32x2xf32>
    %5 = arith.addf %2, %4 : vector<32x2xf32>
    %cst_5 = arith.constant 0.000000e+00 : f32
    %6 = vector.broadcast %cst_5 : f32 to vector<32x2xf32>
    %7 = arith.maximumf %5, %6 : vector<32x2xf32>
    %c0_6 = arith.constant 0 : index
    %c0_7 = arith.constant 0 : index
    %8 = vector.load %arg4[%c0_6, %c0_7] : memref<32x1xf32, #tpu.memory_space<vmem>>, vector<32x1xf32>
    %9 = vector.broadcast %8 : vector<32x1xf32> to vector<32x2xf32>
    %10 = arith.mulf %7, %9 : vector<32x2xf32>
    %cst_8 = arith.constant dense<0.000000e+00> : vector<2xf32>
    %11 = vector.multi_reduction <add>, %10, %cst_8 [0] : vector<32x2xf32> to vector<2xf32>
    %12 = vector.shape_cast %11 : vector<2xf32> to vector<1x2xf32>
    %c0_9 = arith.constant 0 : index
    %13 = memref.load %arg5[%c0_9] : memref<1xf32, #tpu.memory_space<smem>>
    %14 = vector.broadcast %13 : f32 to vector<1x2xf32>
    %15 = arith.addf %12, %14 : vector<1x2xf32>
    %16 = arith.negf %15 : vector<1x2xf32>
    %17 = math.exp %16 : vector<1x2xf32>
    %cst_10 = arith.constant 1.000000e+00 : f32
    %18 = vector.broadcast %cst_10 : f32 to vector<1x2xf32>
    %19 = arith.addf %18, %17 : vector<1x2xf32>
    %20 = arith.divf %18, %19 : vector<1x2xf32>
    %c0_11 = arith.constant 0 : index
    %c0_12 = arith.constant 0 : index
    %21 = vector.load %arg6[%c0_11, %c0_12] : memref<1x2xf32, #tpu.memory_space<vmem>>, vector<1x2xf32>
    tpu.vector_store %arg6[%c0_11, %c0_12], %20 {strides = array<i32>} : memref<1x2xf32, #tpu.memory_space<vmem>>, vector<1x2xf32>,
    return
  }
  func.func @transform_0(%arg0: i32) -> (i32, i32) {
    %c0_i32 = arith.constant 0 : i32
    %c0_i32_0 = arith.constant 0 : i32
    return %c0_i32, %arg0 : i32, i32
  }
  func.func @transform_1(%arg0: i32) -> (i32, i32) {
    %c0_i32 = arith.constant 0 : i32
    %c0_i32_0 = arith.constant 0 : i32
    %c0_i32_1 = arith.constant 0 : i32
    return %c0_i32, %c0_i32_0 : i32, i32
  }
  func.func @transform_2(%arg0: i32) -> (i32, i32) {
    %c0_i32 = arith.constant 0 : i32
    %c0_i32_0 = arith.constant 0 : i32
    %c0_i32_1 = arith.constant 0 : i32
    return %c0_i32, %c0_i32_0 : i32, i32
  }
  func.func @transform_3(%arg0: i32) -> (i32, i32) {
    %c0_i32 = arith.constant 0 : i32
    %c0_i32_0 = arith.constant 0 : i32
    %c0_i32_1 = arith.constant 0 : i32
    return %c0_i32, %c0_i32_0 : i32, i32
  }
  func.func @transform_4(%arg0: i32) -> i32 {
    %c0_i32 = arith.constant 0 : i32
    %c0_i32_0 = arith.constant 0 : i32
    return %c0_i32 : i32
  }
  func.func @transform_5(%arg0: i32) -> (i32, i32) {
    %c0_i32 = arith.constant 0 : i32
    %c0_i32_0 = arith.constant 0 : i32
    return %c0_i32, %arg0 : i32, i32
  }
}

</mosaic_0001>

<bundles_post_ra>
// kernel: discriminator_forward.1
= control target key start
LH: loop header
LB: loop body
LE: loop exit
PB: predicated region body
PF: predicated region fallthrough
CT: control target
= control target key end

     0   :  { %vm64_vm0 = vcmask 1045504   ;;  %vm51_vm1 = vcmask 48128   ;;  %s352_s0 = inlined_call_operand.vmem [shape: f32[6,2], index: 0, kind: input, shape index: {}]   ;;  %s353_s1 = inlined_call_operand.vmem [shape: f32[32,6], index: 1, kind: input, shape index: {}]   ;;  %s354_s2 = inlined_call_operand.vmem [shape: f32[32,1], index: 2, kind: input, shape index: {}]   ;;  %s355_s3 = inlined_call_operand.vmem [shape: f32[32,1], index: 3, kind: input, shape index: {}]   ;;  %s356_s4 = inlined_call_operand.<no memory space> [shape: f32[1], index: 4, kind: input, shape index: {}]   ;;  %s357_s5 = inlined_call_operand.hbm [shape: f32[1,2], index: 5, kind: output, shape index: {}]  }
   0x1   :  { %v26_v0 = vld [vmem:[%s352_s0] sm:$0x3f]  ;;  %v24_v2 = vld [vmem:[%s353_s1 + $0x10] sm:$0xff]  ;;  %v23_v3 = vld [vmem:[%s353_s1 + $0x8] sm:$0xff] }
   0x2   :  { %v22_v1 = vld [vmem:[%s353_s1] sm:$0xff]  ;;  %235 = vmatprep.subr.msk.mxu0 %vm64_vm0, %v26_v0  ;;  %243 = vmatprep.subr.msk.mxu1 %vm64_vm0, %v26_v0  ;;  %v25_v4 = vld [vmem:[%s353_s1 + $0x18] sm:$0xff]  ;;  %v29_v6 = vld [vmem:[%s354_s2 + $0x10] sm:$0xff] }
   0x3   :  { %236 = vmatpush3.msk.msra.mxu0 %vm64_vm0, %v26_v0  ;;  %244 = vmatpush3.msk.msra.mxu1 %vm64_vm0, %v26_v0  ;;  %v27_v5 = vld [vmem:[%s354_s2] sm:$0xff] }
   0x4   :  { %237 = vmatprep.mubr.msk.f32.mxu0 %vm51_vm1, %v22_v1  ;;  %240 = vmatprep.mubr.msk.f32.mxu1 %vm51_vm1, %v24_v2 }
   0x5   :  { %238 = vmatmul.mubr.msk.f32.vlgmr.msra.gmra.mxu0 %vm51_vm1, %v23_v3  ;;  %241 = vmatmul.mubr.msk.f32.vlgmr.msra.gmra.mxu1 %vm51_vm1, %v25_v4 }
   0x6   :  { %11 = vsyncpa [#allocation4], 0  ;;  %v275_v7 = vmov 0   ;;  %v28_v8 = vld [vmem:[%s354_s2 + $0x8] sm:$0xff]  ;;  %v30_v9 = vld [vmem:[%s354_s2 + $0x18] sm:$0xff]  ;;  %vm185_vm2 = vcmask 15360   ;;  %v200_v50 = vstv %s356_s4 }
   0x7   :  { %247 = vset.pattern.permute.xlu0 %v275_v7  ;;  %248 = vset.pattern.permute.xlu1 %v275_v7  ;;  %v157_v10 = vld [vmem:[%s355_s3] sm:$0xff]  ;;  %v158_v11 = vld [vmem:[%s355_s3 + $0x8] sm:$0xff]  ;;  %v159_v12 = vld [vmem:[%s355_s3 + $0x10] sm:$0xff]  ;;  %s276_s17 = smov [#allocation3]   ;;  %vm208_vm3 = vcmask 8192  }
   0x8   :  { %33 = vperm.xlu0 %247, %v27_v5   ;;  %43 = vperm.xlu1 %248, %v29_v6   ;;  %v160_v13 = vld [vmem:[%s355_s3 + $0x18] sm:$0xff]  ;;  %s216_s18 = sshll.u32 %s276_s17, 4  ;;  %s217_s18 = int_to_ptr.vmem [resolvable:$true] %s216_s18 }
   0x9   :  { %s253_s19 = scalar_lea.vmem %s217_s18, 16  ;;  %s257_s20 = scalar_lea.vmem %s217_s18, 32 }
   0xa   :  { %p254_p0 = scmp.ne.s32.totalorder %s217_s18, %s253_s19  ;;  %p258_p1 = scmp.lt.s32.totalorder %s217_s18, %s217_s18 }
   0xb   :  { %p259_p2 = scmp.lt.s32.totalorder %s257_s20, %s253_s19 }
   0xc   :  { %38 = vperm.xlu0 %247, %v28_v8   ;;  %48 = vperm.xlu1 %248, %v30_v9  }
   0xd   :  { %p260_p3 = por %p259_p2, %p258_p1 }
   0xf   :  { %p261_p4 = pnand %p260_p3, %p254_p0 }
  0x10   :  { %163 = vperm.xlu0 %247, %v157_v10   ;;  %168 = vperm.xlu1 %248, %v158_v11  }
  0x14   :  { %173 = vperm.xlu0 %247, %v159_v12   ;;  %178 = vperm.xlu1 %248, %v160_v13  }
  0x83   :  { %v34_v14 = vpop.permute.xlu0 %33  ;;  %v44_v15 = vpop.permute.xlu1 %43 }
  0x87   :  { %v39_v16 = vpop.permute.xlu0 %38  ;;  %v49_v17 = vpop.permute.xlu1 %48 }
  0x8b   :  { %v164_v18 = vpop.permute.xlu0 %163  ;;  %v169_v21 = vpop.permute.xlu1 %168 }
  0x8f   :  { %v174_v33 = vpop.permute.xlu0 %173  ;;  %v179_v36 = vpop.permute.xlu1 %178 }
  0xc5   :  { %v239_v19 = vpop.f32.mrf.mxu0  ;;  %v242_v20 = vpop.f32.mrf.mxu1 }
  0xc6   :  { %v140_v22 = vadd.f32 %v239_v19, %v39_v16  ;;  %v150_v23 = vadd.f32 %v242_v20, %v49_v17 }
  0xc7   :  { %v134_v24 = vpop.f32.mrf.mxu0  ;;  %v144_v25 = vpop.f32.mrf.mxu1 }
  0xc8   :  { %v154_v26 = vmax.f32 %v140_v22, 0.0  ;;  %v135_v27 = vadd.f32 %v134_v24, %v34_v14  ;;  %v145_v28 = vadd.f32 %v144_v25, %v44_v15  ;;  %v156_v30 = vmax.f32 %v150_v23, 0.0 }
  0xca   :  { %v182_v29 = vmul.f32 %v169_v21, %v154_v26  ;;  %v153_v31 = vmax.f32 %v135_v27, 0.0  ;;  %v155_v32 = vmax.f32 %v145_v28, 0.0  ;;  %v184_v38 = vmul.f32 %v179_v36, %v156_v30 }
  0xcc   :  { %v181_v34 = vmul.f32 %v164_v18, %v153_v31  ;;  %v183_v35 = vmul.f32 %v174_v33, %v155_v32  ;;  %v187_v37 = vsel %vm185_vm2, %v182_v29, 0.0  ;;  %v191_v43 = vsel %vm185_vm2, %v184_v38, 0.0 }
  0xce   :  { %v186_v39 = vsel %vm185_vm2, %v181_v34, 0.0  ;;  %v189_v41 = vsel %vm185_vm2, %v183_v35, 0.0 }
  0xcf   :  { %v188_v40 = vadd.f32 %v187_v37, %v186_v39 }
  0xd1   :  { %v190_v42 = vadd.f32 %v189_v41, %v188_v40 }
  0xd3   :  { %v192_v44 = vadd.f32 %v191_v43, %v190_v42 }
  0xd5   :  { %v193_v45 = vrot.slane %v192_v44, 4 }
  0xd7   :  { %v194_v46 = vadd.f32 %v193_v45, %v192_v44 }
  0xd9   :  { %v195_v47 = vrot.slane %v194_v46, 2 }
  0xdb   :  { %v196_v48 = vadd.f32 %v195_v47, %v194_v46 }
  0xdd   :  { %v197_v49 = vrot.slane %v196_v48, 1 }
  0xdf   :  { %v198_v51 = vadd.f32 %v197_v49, %v196_v48 }
  0xe1   :  { %v201_v52 = vadd.f32 %v200_v50, %v198_v51 }
  0xe3   :  { %v229_v53 = vmul.f32 -1.442695, %v201_v52 }
  0xe5   :  { %249 = vpow2.f32 %v229_v53 }
  0xf2   :  { %v250_v54 = vpop.eup %249 }
  0xf3   :  { %v205_v55 = vadd.f32 1.0, %v250_v54 }
  0xf5   :  { %251 = vrcp.f32 %v205_v55 }
 0x102   :  { %v252_v56 = vpop.eup %251 }
 0x103   :  { %209 = vst.msk [vmem:[#allocation3] sm:$0x1] %vm208_vm3, %v252_v56 }
 0x104   :  { %264 = shalt.err (!%p261_p4)
}
 0x105   :  { %219 = dma.vmem_to_hbm [thread:$0]  %s217_s18, 16, %s357_s5, [#allocation4]  }
 0x106   :  { %273 = dma.done.wait [#allocation4], 16  }
 0x107   :  { %274 = vsyncadd [#allocation4], 4294967280 }
 0x108   :  { %223 = vsyncpa [#allocation4], 1 }

</bundles_post_ra>
